<compile_context>
chip_gen: v5e
topology: v5e:2x2
jax: 0.10.0
libtpu: 0.0.40
codegen_flags: <defaults>
</compile_context>

<pallas_src>
import functools

import jax
import jax.numpy as jnp
from jax.experimental import pallas as pl
from jax.experimental.pallas import tpu as pltpu

LANE = 512           # lane width of the dense slab (multiple of 128)
MAX_TILE_ROWS = 1024  # 1024 x 512 x 4 B = 2 MiB per f32 tile (8 MiB VMEM double-buffered)


def _round_up(v, m):
    return ((v + m - 1) // m) * m


def _pick_tiling(total_elems):
    """Rows of the (rows, LANE) slab and the per-step row-tile size."""
    rows_needed = pl.cdiv(total_elems, LANE)
    tile_rows = min(MAX_TILE_ROWS, _round_up(rows_needed, 8))
    # Prefer >= 2 grid steps so dimension_semantics=("parallel",) can shard the
    # grid across v7x's two TensorCores (harmless elsewhere).
    if rows_needed >= 16:
        tile_rows = min(tile_rows, _round_up(pl.cdiv(rows_needed, 2), 8))
    rows = _round_up(rows_needed, tile_rows)
    return rows, tile_rows


def _het_spindly_kernel(w_ref, x_ref, o_ref):
    # w_ref : SMEM (2,)             f32  -> [w1, w2]
    # x_ref : VMEM (tile_rows, LANE)      -> interleaved: even lanes = feat 0, odd = feat 1
    # o_ref : VMEM (tile_rows, LANE) f32
    x = x_ref[...].astype(jnp.float32)
    lane = jax.lax.broadcasted_iota(jnp.int32, x.shape, 1)
    is_feat0 = (lane & 1) == 0
    # exp() is evaluated on feature-0 lanes too; any inf there is discarded by the
    # select and never stored / consumed.
    o_ref[...] = jnp.where(is_feat0, x * w_ref[0], jnp.exp(x * w_ref[1]))


@functools.partial(jax.jit, static_argnames=("min_pallas_n",))
def het_spindly_head(x, weights, *, min_pallas_n=4096):
    """x: [N, C] float (C >= 2); weights: [2] = [lin1.weight, lin2.weight]. Returns [N, 2] f32."""
    n, c = x.shape
    assert c >= 2, "HetSpindlyHead uses features 0 and 1"
    w = jnp.asarray(weights, jnp.float32).reshape(2)

    # Keep only the two used columns; keep bf16 as-is (upcast in-kernel), else f32.
    in_dtype = x.dtype if x.dtype in (jnp.bfloat16, jnp.float32) else jnp.float32
    x2 = x[:, :2].astype(in_dtype)                        # (N, 2), row-major interleaved

    if n < min_pallas_n:
        # Small-N fallback: let XLA fuse the elementwise ops; Pallas fixed costs dominate here.
        x2f = x2.astype(jnp.float32)
        return jnp.concatenate([x2f[:, 0:1] * w[0], jnp.exp(x2f[:, 1:2] * w[1])], axis=1)

    total = 2 * n
    rows, tile_rows = _pick_tiling(total)
    flat = x2.reshape(-1)                                 # free reshape (row-major)
    pad = rows * LANE - total
    if pad:
        flat = jnp.pad(flat, (0, pad))                    # zeros -> exp(0)=1, sliced off below
    xi = flat.reshape(rows, LANE)                         # free reshape -> lane-dense slab

    grid_n = rows // tile_rows

    out2d = pl.pallas_call(
        _het_spindly_kernel,
        out_shape=jax.ShapeDtypeStruct((rows, LANE), jnp.float32),
        grid_spec=pltpu.PrefetchScalarGridSpec(
            num_scalar_prefetch=0,
            grid=(grid_n,),
            in_specs=[
                pl.BlockSpec(memory_space=pltpu.MemorySpace.SMEM),     # weights (2,)
                pl.BlockSpec((tile_rows, LANE), lambda i: (i, 0)),     # input tile
            ],
            out_specs=pl.BlockSpec((tile_rows, LANE), lambda i: (i, 0)),
        ),
        compiler_params=pltpu.CompilerParams(
            dimension_semantics=("parallel",)),
        cost_estimate=pl.CostEstimate(
            flops=2 * rows * LANE,
            transcendentals=rows * LANE,
            bytes_accessed=(xi.dtype.itemsize + 4) * rows * LANE,
        ),
    )(w, xi)

    # Contiguous un-pad + free reshape back to [N, 2].
    return out2d.reshape(-1)[:total].reshape(n, 2)


def het_spindly_head_ref(x, w1, w2):
    out1 = x[:, 0:1].astype(jnp.float32) * w1
    out2 = jnp.exp(x[:, 1:2].astype(jnp.float32) * w2)
    return jnp.concatenate([out1, out2], axis=1)


if __name__ == "__main__":
    key = jax.random.PRNGKey(0)

    # Deterministic parameter init:
    #   lin1.weight -> fixed value (PyTorch default init is random; pinned here)
    #   lin2.weight -> 0.0 (explicitly filled in __init__)
    w1, w2 = 0.5, 0.0
    weights = jnp.asarray([w1, w2], dtype=jnp.float32)

    # Test 1: small N with extra unused feature columns, forced through the Pallas path.
    N1, C1 = 300, 6
    x1 = jax.random.normal(key, (N1, C1), dtype=jnp.float32)
    out1 = jax.block_until_ready(het_spindly_head(x1, weights, min_pallas_n=0))
    ref1 = het_spindly_head_ref(x1, w1, w2)
    assert out1.shape == (N1, 2)
    assert jnp.allclose(out1, ref1, atol=1e-6), (out1, ref1)

    # Test 2: tiny N -> small-N fallback path (plain jnp, XLA-fused).
    N2, C2 = 8, 4
    x2 = jax.random.normal(jax.random.PRNGKey(1), (N2, C2), dtype=jnp.float32)
    out2 = jax.block_until_ready(het_spindly_head(x2, weights))
    ref2 = het_spindly_head_ref(x2, w1, w2)
    assert out2.shape == (N2, 2)
    assert jnp.allclose(out2, ref2, atol=1e-6)

    # Test 3: N spanning multiple grid steps (grid >= 2) through the Pallas path.
    N3, C3 = 5000, 2
    x3 = jax.random.normal(jax.random.PRNGKey(2), (N3, C3), dtype=jnp.float32)
    out3 = jax.block_until_ready(het_spindly_head(x3, weights, min_pallas_n=0))
    ref3 = het_spindly_head_ref(x3, w1, w2)
    assert out3.shape == (N3, 2)
    assert jnp.allclose(out3, ref3, atol=1e-6)

    print("KERNEL_OK")
</pallas_src>

<mosaic_0001>
module attributes {stable_mosaic.version = 11 : i64} {
  func.func @_het_spindly_kernel(%arg0: i32, %arg1: memref<2xf32, #tpu.memory_space<smem>>, %arg2: memref<8x512xf32, #tpu.memory_space<vmem>>, %arg3: memref<8x512xf32, #tpu.memory_space<vmem>>) attributes {dimension_semantics = [#tpu.dimension_semantics<parallel>], iteration_bounds = array<i64: 1>, scalar_prefetch = 0 : i64, scratch_operands = 0 : i64, tpu.core_type = #tpu.core_type<tc>, window_params = [{transform_indices = @transform_0, window_bounds = array<i64: 2>}, {transform_indices = @transform_1, window_bounds = array<i64: 8, 512>}, {transform_indices = @transform_2, window_bounds = array<i64: 8, 512>}]} {
    %c0 = arith.constant 0 : index
    %c0_0 = arith.constant 0 : index
    %0 = vector.load %arg2[%c0, %c0_0] : memref<8x512xf32, #tpu.memory_space<vmem>>, vector<8x512xf32>
    %1 = tpu.iota {dimensions = array<i32: 1>} : vector<8x512xi32>
    %c1_i32 = arith.constant 1 : i32
    %2 = vector.broadcast %c1_i32 : i32 to vector<8x512xi32>
    %3 = arith.andi %1, %2 : vector<8x512xi32>
    %c0_i32 = arith.constant 0 : i32
    %4 = vector.broadcast %c0_i32 : i32 to vector<8x512xi32>
    %5 = arith.cmpi eq, %3, %4 : vector<8x512xi32>
    %c0_1 = arith.constant 0 : index
    %6 = memref.load %arg1[%c0_1] : memref<2xf32, #tpu.memory_space<smem>>
    %7 = vector.broadcast %6 : f32 to vector<8x512xf32>
    %8 = arith.mulf %0, %7 : vector<8x512xf32>
    %c1 = arith.constant 1 : index
    %9 = memref.load %arg1[%c1] : memref<2xf32, #tpu.memory_space<smem>>
    %10 = vector.broadcast %9 : f32 to vector<8x512xf32>
    %11 = arith.mulf %0, %10 : vector<8x512xf32>
    %12 = math.exp %11 : vector<8x512xf32>
    %13 = arith.select %5, %8, %12 : vector<8x512xi1>, vector<8x512xf32>
    %c0_2 = arith.constant 0 : index
    %c0_3 = arith.constant 0 : index
    %14 = vector.load %arg3[%c0_2, %c0_3] : memref<8x512xf32, #tpu.memory_space<vmem>>, vector<8x512xf32>
    tpu.vector_store %arg3[%c0_2, %c0_3], %13 {strides = array<i32>} : memref<8x512xf32, #tpu.memory_space<vmem>>, vector<8x512xf32>,
    return
  }
  func.func @transform_0(%arg0: i32) -> i32 {
    %c0_i32 = arith.constant 0 : i32
    %c0_i32_0 = arith.constant 0 : i32
    return %c0_i32 : i32
  }
  func.func @transform_1(%arg0: i32) -> (i32, i32) {
    %c0_i32 = arith.constant 0 : i32
    %c0_i32_0 = arith.constant 0 : i32
    return %arg0, %c0_i32 : i32, i32
  }
  func.func @transform_2(%arg0: i32) -> (i32, i32) {
    %c0_i32 = arith.constant 0 : i32
    %c0_i32_0 = arith.constant 0 : i32
    return %arg0, %c0_i32 : i32, i32
  }
}

</mosaic_0001>

<bundles_post_ra>
// kernel: het_spindly_head.1
= control target key start
LH: loop header
LB: loop body
LE: loop exit
PB: predicated region body
PF: predicated region fallthrough
CT: control target
= control target key end

     0   :  { %7 = vsyncpa [#allocation3], 0  ;;  %s98_s12 = smov [#allocation2]   ;;  %s141_s0 = inlined_call_operand.vmem [shape: f32[2], index: 0, kind: input, shape index: {}]   ;;  %s142_s1 = inlined_call_operand.vmem [shape: f32[8,512], index: 1, kind: input, shape index: {}]   ;;  %s143_s2 = inlined_call_operand.vmem [shape: f32[8,512], index: 2, kind: output, shape index: {}]  }
   0x1   :  { %s13_s11 = sshll.u32 %s141_s0, 4  ;;  %s14_s11 = int_to_ptr.vmem [resolvable:$true] %s13_s11 }
   0x2   :  { %16 = dma.vmem_to_smem %s14_s11, 16, %s98_s12, [#allocation3]  }
   0x3   :  { %96 = dma.done.wait [#allocation3], 16  }
   0x4   :  { %97 = vsyncadd [#allocation3], 4294967280 }
   0x5   :  { %23 = sfence }
   0x6   :  { %v28_v0 = vlaneseq  ;;  %s74_s13 = sld [smem:[#allocation2 + $0x1]]  ;;  %v24_v1 = vld [vmem:[%s142_s1] sm:$0xff]  ;;  %v25_v3 = vld [vmem:[%s142_s1 + $0x8] sm:$0xff]  ;;  %v26_v4 = vld [vmem:[%s142_s1 + $0x10] sm:$0xff] }
   0x7   :  { %s41_s14 = sld [smem:[#allocation2]]  ;;  %v27_v5 = vld [vmem:[%s142_s1 + $0x18] sm:$0xff] }
   0x8   :  { %v29_v2 = vand.u32 127, %v28_v0 }
   0xa   :  { %v30_v9 = vadd.s32 128, %v29_v2  ;;  %v31_v14 = vadd.s32 256, %v29_v2  ;;  %v32_v16 = vadd.s32 384, %v29_v2  ;;  %v33_v18 = vand.u32 1, %v29_v2 }
   0xc   :  { %v48_v6 = vstv %s74_s13  ;;  %v34_v20 = vand.u32 1, %v30_v9  ;;  %v35_v21 = vand.u32 1, %v31_v14  ;;  %v36_v23 = vand.u32 1, %v32_v16 }
   0xd   :  { %v49_v7 = vmul.f32 %v48_v6, %v24_v1  ;;  %v50_v8 = vmul.f32 %v48_v6, %v25_v3  ;;  %v51_v10 = vmul.f32 %v48_v6, %v26_v4  ;;  %v52_v11 = vmul.f32 %v48_v6, %v27_v5 }
   0xe   :  { %v42_v19 = vstv %s41_s14  ;;  %vm37_vm0 = vcmp.eq.s32.totalorder %v33_v18, 0  ;;  %vm38_vm1 = vcmp.eq.s32.totalorder %v34_v20, 0  ;;  %vm39_vm2 = vcmp.eq.s32.totalorder %v35_v21, 0 }
   0xf   :  { %v53_v12 = vmul.f32 1.442695, %v49_v7  ;;  %v55_v13 = vmul.f32 1.442695, %v50_v8  ;;  %v57_v15 = vmul.f32 1.442695, %v51_v10  ;;  %v43_v22 = vmul.f32 %v42_v19, %v24_v1 }
  0x10   :  { %v59_v17 = vmul.f32 1.442695, %v52_v11  ;;  %v44_v24 = vmul.f32 %v42_v19, %v25_v3  ;;  %v45_v25 = vmul.f32 %v42_v19, %v26_v4  ;;  %v46_v27 = vmul.f32 %v42_v19, %v27_v5 }
  0x11   :  { %76 = vpow2.f32 %v53_v12  ;;  %vm40_vm3 = vcmp.eq.s32.totalorder %v36_v23, 0 }
  0x12   :  { %78 = vpow2.f32 %v55_v13 }
  0x13   :  { %80 = vpow2.f32 %v57_v15 }
  0x14   :  { %82 = vpow2.f32 %v59_v17 }
  0x17   :  { %v77_v26 = vpop.eup %76 }
  0x18   :  { %v79_v28 = vpop.eup %78  ;;  %v61_v29 = vsel %vm37_vm0, %v43_v22, %v77_v26 }
  0x19   :  { %v81_v30 = vpop.eup %80  ;;  %65 = vst [vmem:[%s143_s2] sm:$0xff] %v61_v29  ;;  %v62_v31 = vsel %vm38_vm1, %v44_v24, %v79_v28 }
  0x1a   :  { %v83_v32 = vpop.eup %82  ;;  %66 = vst [vmem:[%s143_s2 + $0x8] sm:$0xff] %v62_v31  ;;  %v63_v33 = vsel %vm39_vm2, %v45_v25, %v81_v30 }
  0x1b   :  { %67 = vst [vmem:[%s143_s2 + $0x10] sm:$0xff] %v63_v33  ;;  %v64_v34 = vsel %vm40_vm3, %v46_v27, %v83_v32 }
  0x1c   :  { %68 = vst [vmem:[%s143_s2 + $0x18] sm:$0xff] %v64_v34 }
  0x1d   :  { %73 = vsyncpa [#allocation3], 1 }

</bundles_post_ra>
